<compile_context>
chip_gen: v6e
topology: v6e:2x2x1
jax: 0.10.0
libtpu: 0.0.40
codegen_flags: <defaults>
</compile_context>

<pallas_src>
import jax
import jax.numpy as jnp
from jax.experimental import pallas as pl
from jax.experimental.pallas import tpu as pltpu


def mlp_kernel(xT_ref, w1c0_ref, w1c1_ref, b1_ref, w2_ref, b2_ref,
               w3_ref, b3_ref, oT_ref):
    # xT_ref: (2, TB) -- batch on the lane axis.
    xT = xT_ref[...]
    x0 = xT[0:1, :]                                        # (1, TB) sublane slice
    x1 = xT[1:2, :]                                        # (1, TB)

    # Layer 1: K=2 contraction as a VPU outer-product (two broadcast FMAs), skipping the MXU.
    h1 = w1c0_ref[...] * x0 + w1c1_ref[...] * x1           # (n, TB)
    h1 = jnp.tanh(h1 + b1_ref[...])                        # funact = tanh (EUP)

    # Layer 2: n x n matmul on the MXU; batch stays on the lane axis.
    h2 = jnp.dot(w2_ref[...], h1, preferred_element_type=jnp.float32)   # (n, TB)
    h2 = jnp.tanh(h2 + b2_ref[...])

    # Layer 3: (2, n) @ (n, TB) -> (2, TB); lane-dense store.
    out = jnp.dot(w3_ref[...], h2, preferred_element_type=jnp.float32)
    oT_ref[...] = (out + b3_ref[...]).astype(oT_ref.dtype)


def modelo_forward(x, params, *, tile_b=None):
    """x: (B, 2) float32.  params in PyTorch layout:
       w1 (n,2), b1 (n,1), w2 (n,n), b2 (n,1), w3 (2,n), b3 (2,1)."""
    B, F = x.shape
    assert F == 2
    n = params["w1"].shape[0]

    if tile_b is None:
        if B % 256 == 0:
            # >=2 parallel grid steps (feeds both TensorCores on v7x), 128..1024-lane tiles.
            tile_b = min(B // 2, 1024)
            while B % tile_b:
                tile_b //= 2
        else:
            tile_b = B                     # single full-slab step; always a legal block shape
    assert B % tile_b == 0
    grid = (B // tile_b,)

    # Layout plumbing outside the kernel: batch onto the lane axis, split w1's two columns.
    xT = x.T                               # (2, B)
    w1c0 = params["w1"][:, 0:1]            # (n, 1)
    w1c1 = params["w1"][:, 1:2]            # (n, 1)

    # Weights/biases: full (untiled) blocks with constant index maps (a few KiB at n=32, so
    # default double-buffering is irrelevant and the near-singleton grid makes pipelining moot).
    # TODO(synk): for very large n (>~2k) tile w2 over K with an f32 VMEM accumulator so the
    # double-buffered (n,n) block stays inside v7x's 64 MiB VMEM.
    full = lambda shape: pl.BlockSpec(shape, lambda i: (0,) * len(shape))

    flops = 2 * B * (2 * n + n * n + n * 2)
    transcendentals = 2 * B * n
    bytes_accessed = 4 * (int(x.size) + sum(int(v.size) for v in params.values()) + B * 2)

    outT = pl.pallas_call(
        mlp_kernel,
        out_shape=jax.ShapeDtypeStruct((2, B), jnp.float32),
        grid=grid,
        in_specs=[
            pl.BlockSpec((2, tile_b), lambda i: (0, i)),   # x^T lane tile
            full((n, 1)),                                  # w1 column 0
            full((n, 1)),                                  # w1 column 1
            full((n, 1)),                                  # b1
            full((n, n)),                                  # w2
            full((n, 1)),                                  # b2
            full((2, n)),                                  # w3
            full((2, 1)),                                  # b3
        ],
        out_specs=pl.BlockSpec((2, tile_b), lambda i: (0, i)),
        compiler_params=pltpu.CompilerParams(
            dimension_semantics=("parallel",),
        ),
        cost_estimate=pl.CostEstimate(
            flops=flops,
            transcendentals=transcendentals,
            bytes_accessed=bytes_accessed,
        ),
    )(xT, w1c0, w1c1, params["b1"], params["w2"], params["b2"],
      params["w3"], params["b3"])

    return outT.T                          # back to (B, 2)


def init_params(key, n):
    # Deterministic synthetic init, shapes follow nn.Linear(2,n), nn.Linear(n,n), nn.Linear(n,2)
    # in native PyTorch layout (weight: [out_features, in_features]).
    k1, k2, k3, k4, k5, k6 = jax.random.split(key, 6)
    s1 = 1.0 / jnp.sqrt(2.0)
    s2 = 1.0 / jnp.sqrt(float(n))
    return {
        "w1": jax.random.uniform(k1, (n, 2), jnp.float32, -s1, s1),
        "b1": jax.random.uniform(k2, (n, 1), jnp.float32, -s1, s1),
        "w2": jax.random.uniform(k3, (n, n), jnp.float32, -s2, s2),
        "b2": jax.random.uniform(k4, (n, 1), jnp.float32, -s2, s2),
        "w3": jax.random.uniform(k5, (2, n), jnp.float32, -s2, s2),
        "b3": jax.random.uniform(k6, (2, 1), jnp.float32, -s2, s2),
    }


def modelo_reference(x, p):
    h1 = jnp.tanh(x @ p["w1"].T + p["b1"].T)
    h2 = jnp.tanh(h1 @ p["w2"].T + p["b2"].T)
    return h2 @ p["w3"].T + p["b3"].T


if __name__ == "__main__":
    key = jax.random.PRNGKey(0)
    kx, kp = jax.random.split(key)

    n = 32           # hidden width (the `n` ctor arg); funact = tanh
    B = 256          # batch of 2-D points -> tile_b=128, grid=(2,) parallel
    x = jax.random.normal(kx, (B, 2), dtype=jnp.float32)
    params = init_params(kp, n)

    out = modelo_forward(x, params)
    out = jax.block_until_ready(out)

    ref = modelo_reference(x, params)
    assert out.shape == (B, 2)
    assert jnp.allclose(out, ref, atol=1e-5, rtol=1e-5), "mismatch vs reference"

    print("KERNEL_OK")
</pallas_src>

<mosaic_0001>
module attributes {stable_mosaic.version = 11 : i64} {
  func.func @mlp_kernel(%arg0: i32, %arg1: memref<2x128xf32, #tpu.memory_space<vmem>>, %arg2: memref<32x1xf32, #tpu.memory_space<vmem>>, %arg3: memref<32x1xf32, #tpu.memory_space<vmem>>, %arg4: memref<32x1xf32, #tpu.memory_space<vmem>>, %arg5: memref<32x32xf32, #tpu.memory_space<vmem>>, %arg6: memref<32x1xf32, #tpu.memory_space<vmem>>, %arg7: memref<2x32xf32, #tpu.memory_space<vmem>>, %arg8: memref<2x1xf32, #tpu.memory_space<vmem>>, %arg9: memref<2x128xf32, #tpu.memory_space<vmem>>) attributes {dimension_semantics = [#tpu.dimension_semantics<parallel>], iteration_bounds = array<i64: 2>, scalar_prefetch = 0 : i64, scratch_operands = 0 : i64, tpu.core_type = #tpu.core_type<tc>, window_params = [{transform_indices = @transform_0, window_bounds = array<i64: 2, 128>}, {pipeline_mode = #tpu.pipeline_mode<synchronous>, transform_indices = @transform_1, window_bounds = array<i64: 32, 1>}, {pipeline_mode = #tpu.pipeline_mode<synchronous>, transform_indices = @transform_2, window_bounds = array<i64: 32, 1>}, {pipeline_mode = #tpu.pipeline_mode<synchronous>, transform_indices = @transform_3, window_bounds = array<i64: 32, 1>}, {pipeline_mode = #tpu.pipeline_mode<synchronous>, transform_indices = @transform_4, window_bounds = array<i64: 32, 32>}, {pipeline_mode = #tpu.pipeline_mode<synchronous>, transform_indices = @transform_5, window_bounds = array<i64: 32, 1>}, {pipeline_mode = #tpu.pipeline_mode<synchronous>, transform_indices = @transform_6, window_bounds = array<i64: 2, 32>}, {pipeline_mode = #tpu.pipeline_mode<synchronous>, transform_indices = @transform_7, window_bounds = array<i64: 2, 1>}, {transform_indices = @transform_8, window_bounds = array<i64: 2, 128>}]} {
    %c0 = arith.constant 0 : index
    %c0_0 = arith.constant 0 : index
    %0 = vector.load %arg1[%c0, %c0_0] : memref<2x128xf32, #tpu.memory_space<vmem>>, vector<2x128xf32>
    %1 = vector.extract_strided_slice %0 {offsets = [0, 0], sizes = [1, 128], strides = [1, 1]} : vector<2x128xf32> to vector<1x128xf32>
    %2 = vector.extract_strided_slice %0 {offsets = [1, 0], sizes = [1, 128], strides = [1, 1]} : vector<2x128xf32> to vector<1x128xf32>
    %c0_1 = arith.constant 0 : index
    %c0_2 = arith.constant 0 : index
    %3 = vector.load %arg2[%c0_1, %c0_2] : memref<32x1xf32, #tpu.memory_space<vmem>>, vector<32x1xf32>
    %4 = vector.broadcast %3 : vector<32x1xf32> to vector<32x128xf32>
    %5 = vector.broadcast %1 : vector<1x128xf32> to vector<32x128xf32>
    %6 = arith.mulf %4, %5 : vector<32x128xf32>
    %c0_3 = arith.constant 0 : index
    %c0_4 = arith.constant 0 : index
    %7 = vector.load %arg3[%c0_3, %c0_4] : memref<32x1xf32, #tpu.memory_space<vmem>>, vector<32x1xf32>
    %8 = vector.broadcast %7 : vector<32x1xf32> to vector<32x128xf32>
    %9 = vector.broadcast %2 : vector<1x128xf32> to vector<32x128xf32>
    %10 = arith.mulf %8, %9 : vector<32x128xf32>
    %11 = arith.addf %6, %10 : vector<32x128xf32>
    %c0_5 = arith.constant 0 : index
    %c0_6 = arith.constant 0 : index
    %12 = vector.load %arg4[%c0_5, %c0_6] : memref<32x1xf32, #tpu.memory_space<vmem>>, vector<32x1xf32>
    %13 = vector.broadcast %12 : vector<32x1xf32> to vector<32x128xf32>
    %14 = arith.addf %11, %13 : vector<32x128xf32>
    %15 = math.tanh %14 : vector<32x128xf32>
    %c0_7 = arith.constant 0 : index
    %c0_8 = arith.constant 0 : index
    %16 = vector.load %arg5[%c0_7, %c0_8] : memref<32x32xf32, #tpu.memory_space<vmem>>, vector<32x32xf32>
    %cst = arith.constant dense<0.000000e+00> : vector<32x128xf32>
    %17 = tpu.matmul %16, %15, %cst {dimension_numbers = #tpu.dot_dimension_numbers<[1], [0], [0], [1], [0, 0, 1, 1], [], []>} : vector<32x32xf32>, vector<32x128xf32>, vector<32x128xf32> -> vector<32x128xf32>
    %c0_9 = arith.constant 0 : index
    %c0_10 = arith.constant 0 : index
    %18 = vector.load %arg6[%c0_9, %c0_10] : memref<32x1xf32, #tpu.memory_space<vmem>>, vector<32x1xf32>
    %19 = vector.broadcast %18 : vector<32x1xf32> to vector<32x128xf32>
    %20 = arith.addf %17, %19 : vector<32x128xf32>
    %21 = math.tanh %20 : vector<32x128xf32>
    %c0_11 = arith.constant 0 : index
    %c0_12 = arith.constant 0 : index
    %22 = vector.load %arg7[%c0_11, %c0_12] : memref<2x32xf32, #tpu.memory_space<vmem>>, vector<2x32xf32>
    %cst_13 = arith.constant dense<0.000000e+00> : vector<2x128xf32>
    %23 = tpu.matmul %22, %21, %cst_13 {dimension_numbers = #tpu.dot_dimension_numbers<[1], [0], [0], [1], [0, 0, 1, 1], [], []>} : vector<2x32xf32>, vector<32x128xf32>, vector<2x128xf32> -> vector<2x128xf32>
    %c0_14 = arith.constant 0 : index
    %c0_15 = arith.constant 0 : index
    %24 = vector.load %arg8[%c0_14, %c0_15] : memref<2x1xf32, #tpu.memory_space<vmem>>, vector<2x1xf32>
    %25 = vector.broadcast %24 : vector<2x1xf32> to vector<2x128xf32>
    %26 = arith.addf %23, %25 : vector<2x128xf32>
    %c0_16 = arith.constant 0 : index
    %c0_17 = arith.constant 0 : index
    %27 = vector.load %arg9[%c0_16, %c0_17] : memref<2x128xf32, #tpu.memory_space<vmem>>, vector<2x128xf32>
    tpu.vector_store %arg9[%c0_16, %c0_17], %26 {strides = array<i32>} : memref<2x128xf32, #tpu.memory_space<vmem>>, vector<2x128xf32>,
    return
  }
  func.func @transform_0(%arg0: i32) -> (i32, i32) {
    %c0_i32 = arith.constant 0 : i32
    %c0_i32_0 = arith.constant 0 : i32
    return %c0_i32, %arg0 : i32, i32
  }
  func.func @transform_1(%arg0: i32) -> (i32, i32) {
    %c0_i32 = arith.constant 0 : i32
    %c0_i32_0 = arith.constant 0 : i32
    %c0_i32_1 = arith.constant 0 : i32
    return %c0_i32, %c0_i32_0 : i32, i32
  }
  func.func @transform_2(%arg0: i32) -> (i32, i32) {
    %c0_i32 = arith.constant 0 : i32
    %c0_i32_0 = arith.constant 0 : i32
    %c0_i32_1 = arith.constant 0 : i32
    return %c0_i32, %c0_i32_0 : i32, i32
  }
  func.func @transform_3(%arg0: i32) -> (i32, i32) {
    %c0_i32 = arith.constant 0 : i32
    %c0_i32_0 = arith.constant 0 : i32
    %c0_i32_1 = arith.constant 0 : i32
    return %c0_i32, %c0_i32_0 : i32, i32
  }
  func.func @transform_4(%arg0: i32) -> (i32, i32) {
    %c0_i32 = arith.constant 0 : i32
    %c0_i32_0 = arith.constant 0 : i32
    %c0_i32_1 = arith.constant 0 : i32
    return %c0_i32, %c0_i32_0 : i32, i32
  }
  func.func @transform_5(%arg0: i32) -> (i32, i32) {
    %c0_i32 = arith.constant 0 : i32
    %c0_i32_0 = arith.constant 0 : i32
    %c0_i32_1 = arith.constant 0 : i32
    return %c0_i32, %c0_i32_0 : i32, i32
  }
  func.func @transform_6(%arg0: i32) -> (i32, i32) {
    %c0_i32 = arith.constant 0 : i32
    %c0_i32_0 = arith.constant 0 : i32
    %c0_i32_1 = arith.constant 0 : i32
    return %c0_i32, %c0_i32_0 : i32, i32
  }
  func.func @transform_7(%arg0: i32) -> (i32, i32) {
    %c0_i32 = arith.constant 0 : i32
    %c0_i32_0 = arith.constant 0 : i32
    %c0_i32_1 = arith.constant 0 : i32
    return %c0_i32, %c0_i32_0 : i32, i32
  }
  func.func @transform_8(%arg0: i32) -> (i32, i32) {
    %c0_i32 = arith.constant 0 : i32
    %c0_i32_0 = arith.constant 0 : i32
    return %c0_i32, %arg0 : i32, i32
  }
}

</mosaic_0001>

<bundles_post_ra>
// kernel: tpu_custom_call.1
= control target key start
LH: loop header
LB: loop body
LE: loop exit
PB: predicated region body
PF: predicated region fallthrough
CT: control target
= control target key end

     0   :  { %13 = vsyncpa [#allocation3], 0  ;;  %s1074_s0 = inlined_call_operand.vmem [shape: f32[2,256], index: 0, kind: input, shape index: {}]   ;;  %s1075_s1 = inlined_call_operand.vmem [shape: f32[32,1], index: 1, kind: input, shape index: {}]   ;;  %s1076_s2 = inlined_call_operand.vmem [shape: f32[32,1], index: 2, kind: input, shape index: {}]   ;;  %s1077_s3 = inlined_call_operand.vmem [shape: f32[32,1], index: 3, kind: input, shape index: {}]   ;;  %s1078_s4 = inlined_call_operand.vmem [shape: f32[32,32], index: 4, kind: input, shape index: {}]   ;;  %s1079_s5 = inlined_call_operand.vmem [shape: f32[32,1], index: 5, kind: input, shape index: {}]   ;;  %s1080_s6 = inlined_call_operand.vmem [shape: f32[2,32], index: 6, kind: input, shape index: {}]   ;;  %s1081_s7 = inlined_call_operand.vmem [shape: f32[2,1], index: 7, kind: input, shape index: {}]   ;;  %s1082_s8 = inlined_call_operand.hbm [shape: f32[2,256], index: 8, kind: output, shape index: {}]  }
   0x1   :  { %15 = vsyncpa [#allocation3 + $0x1], 0  ;;  %s910_s27 = smov 0   ;;  %s912_s28 = smov 0  }
   0x2   :  { %s914_s29 = smov 0   ;;  %s916_s30 = smov 0  }
   0x3 LB: > { %s931_s9 = sadd.s32 4294967295, %s859_s30   ;;  %s686_s10 = sadd.s32 4294967294, %s859_s30   ;;  %s859_s30 = sphi %s916_s30, %s1088_s30   ;;  %s855_s29 = sphi %s914_s29, %s1087_s29   ;;  %s851_s28 = sphi %s912_s28, %s1086_s28   ;;  %s847_s27 = sphi %s910_s27, %s1085_s27  }
   0x4   : > { %s935_s11 = sadd.s32 1, %s859_s30   ;;  %s201_s12 = sadd.s32 1, %s855_s29 }
   0x5   : > { %s198_s13 = ssub.s32 %s859_s30, %s935_s11  ;;  %p211_p0 = scmp.ne.s32.totalorder %s855_s29, %s851_s28 }
   0x6   : > { %p199_p1 = scmp.eq.s32.totalorder %s198_s13, 0  ;;  %p212_p2 = scmp.eq.s32.totalorder %s931_s9, 1 }
   0x7   : > { %p217_p3 = scmp.ne.s32.totalorder %s851_s28, %s847_s27  ;;  %p218_p4 = scmp.eq.s32.totalorder %s686_s10, 1 }
   0x8   : > { %s946_s14 = scalar_select %p199_p1, %s855_s29, %s201_s12  }
   0x9   : > { %p948_p5 = por %p212_p2, %p211_p0  ;;  %p952_p6 = por %p218_p4, %p217_p3 }
   0xa   : > { %p689_p7 = scmp.ge.s32.totalorder %s859_s30, 1  ;;  %p264_p8 = scmp.lt.s32.totalorder %s859_s30, 3 }
   0xc   : > { %p265_p9 = pnand %p689_p7, %p264_p8 }
   0xd   : > { %p297_p10 = scmp.lt.s32.totalorder (!%p265_p9), %s931_s9, 1  ;;  %s698_s13 = sshll.u32 (!%p265_p9), %s931_s9, 5 }
   0xe   : > { %268 = sbr.rel (%p265_p9) target bundleno = 613 (0x265), region = 52  ;;  %s1039_s21 = scalar_lea.hbm (!%p265_p9), %s1082_s8, %s698_s13 }
  0x13   : > { %v305_v0 = vld [vmem:[%s1075_s1 + $0x18] sm:$0xff]  ;;  %v304_v1 = vld [vmem:[%s1075_s1 + $0x10] sm:$0xff]  ;;  %v861_v2 = vmov 0   ;;  %v335_v5 = vld [vmem:[%s1076_s2 + $0x8] sm:$0xff]  ;;  %vm430_vm0 = vcmask 261120   ;;  %s298_s10 = scalar_select %p297_p10, %s931_s9, 1  ;;  %v326_v19 = vlaneseq }
  0x14   : > { %782 = vset.pattern.permute.xlu1 %v861_v2  ;;  %781 = vset.pattern.permute.xlu0 %v861_v2  ;;  %v337_v3 = vld [vmem:[%s1076_s2 + $0x18] sm:$0xff]  ;;  %v336_v4 = vld [vmem:[%s1076_s2 + $0x10] sm:$0xff]  ;;  %v303_v6 = vld [vmem:[%s1075_s1 + $0x8] sm:$0xff]  ;;  %v862_v61 = vmov 0.0   ;;  %vm863_vm1 = vmmov 0   ;;  %s864_s9 = smov [#allocation2]  }
  0x15   : > { %323 = vperm.xlu0 %781, %v305_v0   ;;  %318 = vperm.xlu1 %782, %v304_v1   ;;  %v373_v7 = vld [vmem:[%s1077_s3 + $0x18] sm:$0xff]  ;;  %v302_v8 = vld [vmem:[%s1075_s1] sm:$0xff]  ;;  %v372_v10 = vld [vmem:[%s1077_s3 + $0x10] sm:$0xff]  ;;  %s691_s12 = sshll.u32 %s298_s10, 1  ;;  %v327_v20 = vshrl.u32 %v326_v19, 7  ;;  %s294_s10 = sand.u32 1, %s851_s28  }
  0x16   : > { %v334_v9 = vld [vmem:[%s1076_s2] sm:$0xff]  ;;  %v371_v11 = vld [vmem:[%s1077_s3 + $0x8] sm:$0xff]  ;;  %v409_v13 = vld [vmem:[%s1079_s5 + $0x18] sm:$0xff]  ;;  %s300_s18 = scalar_lea.vmem %s1074_s0, %s691_s12  ;;  %728 = vmatprep.subr.mxu1 %v862_v61  ;;  %736 = vmatprep.mubr.msk.f32.mxu1 %vm863_vm1, %v862_v61  ;;  %s690_s12 = sshll.u32 %s294_s10, 1 }
  0x17   : > { %v370_v12 = vld [vmem:[%s1077_s3] sm:$0xff]  ;;  %v408_v14 = vld [vmem:[%s1079_s5 + $0x10] sm:$0xff]  ;;  %v407_v15 = vld [vmem:[%s1079_s5 + $0x8] sm:$0xff]  ;;  %v360_v21 = vsub.s32 1, %v327_v20  ;;  %v328_v24 = vsub.s32 0, %v327_v20  ;;  %s296_s17 = scalar_lea.vmem [#allocation2], %s690_s12 }
  0x18   : > { %v406_v16 = vld [vmem:[%s1079_s5] sm:$0xff]  ;;  %v403_v58 = vld [vmem:[%s1078_s4 + $0x8] sm:$0xff]  ;;  %v404_v59 = vld [vmem:[%s1078_s4 + $0x10] sm:$0xff]  ;;  %s614_s22 = scalar_lea.sflag [#allocation3], %s294_s10  ;;  %s803_s24 = sshll.u32 %s864_s9, 4  ;;  %s804_s24 = int_to_ptr.vmem [resolvable:$false] %s803_s24 }
  0x19   : > { %355 = vperm.xlu0 %781, %v337_v3   ;;  %350 = vperm.xlu1 %782, %v336_v4   ;;  %v533_v17 = vld [vmem:[%s1081_s7] sm:$0x3]  ;;  %v405_v60 = vld [vmem:[%s1078_s4 + $0x18] sm:$0xff]  ;;  %s805_s25 = scalar_lea.vmem %s804_s24, 64 }
  0x1a   : > { %v402_v18 = vld [vmem:[%s1078_s4] sm:$0xff] }
  0x1b   : > { %722 = vmatprep.mubr.msk.f32.mxu0 %vm430_vm0, %v402_v18  ;;  %v301_v25 = vld [vmem:[%s300_s18] sm:$0x3]  ;;  %s627_s18 = sshll.u32 %s296_s17, 4  ;;  %s628_s18 = int_to_ptr.vmem [resolvable:$true] %s627_s18 }
  0x1c   : > { %v361_v26 = vrot.slane %v301_v25, %v360_v21  ;;  %v329_v29 = vrot.slane %v301_v25, %v328_v24  ;;  %s799_s23 = scalar_lea.vmem %s628_s18, 32  ;;  %p806_p0 = scmp.lt.s32.totalorder %s628_s18, %s804_s24 }
  0x1d   : > { %345 = vperm.xlu1 %782, %v335_v5   ;;  %313 = vperm.xlu0 %781, %v303_v6   ;;  %p800_p11 = scmp.ne.s32.totalorder %s628_s18, %s799_s23  ;;  %p807_p1 = scmp.lt.s32.totalorder %s805_s25, %s799_s23 }
  0x1f   : > { %p801_p12 = pnand %p800_p11, %p948_p5  ;;  %p808_p2 = por %p807_p1, %p806_p0 }
  0x21   : > { %391 = vperm.xlu0 %781, %v373_v7   ;;  %308 = vperm.xlu1 %782, %v302_v8   ;;  %p802_p13 = pneg %p801_p12 }
  0x23   : > { %p809_p3 = pnand %p808_p2, %p802_p13 }
  0x25   : > { %340 = vperm.xlu0 %781, %v334_v9   ;;  %386 = vperm.xlu1 %782, %v372_v10  }
  0x29   : > { %381 = vperm.xlu0 %781, %v371_v11   ;;  %376 = vperm.xlu1 %782, %v370_v12  }
  0x2d   : > { %427 = vperm.xlu0 %781, %v409_v13   ;;  %422 = vperm.xlu1 %782, %v408_v14   ;;  %v532_v13 = vld [vmem:[%s1080_s6] sm:$0x3] }
  0x31   : > { %417 = vperm.xlu0 %781, %v407_v15   ;;  %412 = vperm.xlu1 %782, %v406_v16  }
  0x35   : > { %536 = vperm.xlu0 %781, %v533_v17  }
  0x90   : > { %v324_v22 = vpop.permute.xlu0 %323  ;;  %v319_v23 = vpop.permute.xlu1 %318 }
  0x91   : > { %v333_v33 = vmul.f32 %v329_v29, %v324_v22  ;;  %v332_v38 = vmul.f32 %v329_v29, %v319_v23 }
  0x94   : > { %v356_v27 = vpop.permute.xlu0 %355  ;;  %v351_v28 = vpop.permute.xlu1 %350 }
  0x95   : > { %v365_v30 = vmul.f32 %v361_v26, %v356_v27  ;;  %v364_v34 = vmul.f32 %v361_v26, %v351_v28 }
  0x97   : > { %v369_v35 = vadd.f32 %v365_v30, %v333_v33  ;;  %v368_v42 = vadd.f32 %v364_v34, %v332_v38 }
  0x98   : > { %v346_v31 = vpop.permute.xlu1 %345  ;;  %v314_v32 = vpop.permute.xlu0 %313 }
  0x99   : > { %v363_v40 = vmul.f32 %v361_v26, %v346_v31  ;;  %v331_v41 = vmul.f32 %v329_v29, %v314_v32 }
  0x9b   : > { %v367_v48 = vadd.f32 %v363_v40, %v331_v41 }
  0x9c   : > { %v392_v36 = vpop.permute.xlu0 %391  ;;  %v309_v37 = vpop.permute.xlu1 %308 }
  0x9d   : > { %v397_v39 = vadd.f32 %v392_v36, %v369_v35  ;;  %v330_v45 = vmul.f32 %v329_v29, %v309_v37 }
  0x9f   : > { %783 = vtanh.f32 %v397_v39 }
  0xa0   : > { %v341_v43 = vpop.permute.xlu0 %340  ;;  %v387_v44 = vpop.permute.xlu1 %386 }
  0xa1   : > { %v362_v46 = vmul.f32 %v361_v26, %v341_v43  ;;  %v396_v47 = vadd.f32 %v387_v44, %v368_v42 }
  0xa3   : > { %785 = vtanh.f32 %v396_v47  ;;  %v366_v49 = vadd.f32 %v362_v46, %v330_v45 }
  0xa4   : > { %v382_v50 = vpop.permute.xlu0 %381  ;;  %v377_v51 = vpop.permute.xlu1 %376 }
  0xa5   : > { %v395_v52 = vadd.f32 %v382_v50, %v367_v48  ;;  %v394_v53 = vadd.f32 %v377_v51, %v366_v49 }
  0xa7   : > { %787 = vtanh.f32 %v395_v52 }
  0xa8   : > { %789 = vtanh.f32 %v394_v53  ;;  %v428_v62 = vpop.permute.xlu0 %427  ;;  %v423_v0 = vpop.permute.xlu1 %422 }
  0xac   : > { %v784_v54 = vpop.eup %783  ;;  %v418_v4 = vpop.permute.xlu0 %417 }
  0xad   : > { %714 = vmatprep.subr.mxu0 %v784_v54  ;;  %v413_v8 = vpop.permute.xlu1 %412 }
  0xae   : > { %715 = vmatpush3.msra.mxu0 %v784_v54 }
  0xb0   : > { %v786_v55 = vpop.eup %785  ;;  %v537_v15 = vpop.permute.xlu0 %536 }
  0xb1   : > { %716 = vmatprep.subr.mxu0 %v786_v55 }
  0xb2   : > { %717 = vmatpush3.msra.mxu0 %v786_v55 }
  0xb4   : > { %v788_v56 = vpop.eup %787 }
  0xb5   : > { %718 = vmatprep.subr.mxu0 %v788_v56  ;;  %v790_v57 = vpop.eup %789 }
  0xb6   : > { %719 = vmatpush3.msra.mxu0 %v788_v56 }
  0xb7   : > { %720 = vmatprep.subr.mxu0 %v790_v57 }
  0xb8   : > { %721 = vmatpush3.msra.mxu0 %v790_v57 }
  0xb9   : > { %723 = vmatmul.mubr.msk.f32.vlgmr.msra.gmra.mxu0 %vm430_vm0, %v403_v58 }
  0xba   : > { %725 = vmatprep.mubr.msk.f32.mxu0 %vm430_vm0, %v404_v59 }
  0xbd   : > { %726 = vmatmul.mubr.msk.f32.gmra.mxu0 %vm430_vm0, %v405_v60 }
 0x179   : > { %v724_v63 = vpop.f32.mrf.mxu0 }
 0x17a   : > { %v515_v6 = vadd.f32 %v724_v63, %v418_v4 }
 0x17b   : > { %v509_v1 = vpop.f32.mrf.mxu0 }
 0x17c   : > { %v510_v9 = vadd.f32 %v509_v1, %v413_v8 }
 0x17d   : > { %v727_v2 = vpop.f32.mrf.mxu0 }
 0x17e   : > { %v525_v3 = vadd.f32 %v727_v2, %v428_v62 }
 0x17f   : > { %v519_v5 = vpop.f32.mrf.mxu0 }
 0x180   : > { %791 = vtanh.f32 %v525_v3  ;;  %v520_v7 = vadd.f32 %v519_v5, %v423_v0 }
 0x182   : > { %793 = vtanh.f32 %v520_v7 }
 0x183   : > { %795 = vtanh.f32 %v515_v6 }
 0x184   : > { %797 = vtanh.f32 %v510_v9 }
 0x18d   : > { %v792_v10 = vpop.eup %791 }
 0x18e   : > { %729 = vmatpush3.msra.mxu1 %v792_v10 }
 0x18f   : > { %v794_v11 = vpop.eup %793  ;;  %730 = vmatprep.subr.mxu1 %v862_v61 }
 0x190   : > { %731 = vmatpush3.msra.mxu1 %v794_v11  ;;  %v796_v12 = vpop.eup %795 }
 0x191   : > { %732 = vmatprep.subr.mxu1 %v862_v61  ;;  %v798_v14 = vpop.eup %797 }
 0x192   : > { %733 = vmatpush3.msra.mxu1 %v796_v12 }
 0x193   : > { %734 = vmatprep.subr.mxu1 %v862_v61 }
 0x194   : > { %735 = vmatpush3.msra.mxu1 %v798_v14 }
 0x195   : > { %737 = vmatmul.mubr.msk.f32.vlgmr.msra.gmra.mxu1 %vm430_vm0, %v532_v13 }
 0x255   : > { %v608_v16 = vpop.f32.mrf.mxu1 }
 0x256   : > { %v609_v17 = vadd.f32 %v608_v16, %v537_v15 }
 0x257   : > { %v738_v18 = vpop.f32.mrf.mxu1 }
 0x258   : > { %612 = vst [vmem:[%s296_s17] sm:$0x3] %v609_v17 }
 0x259   : > { %812 = shalt.err (!%p809_p3)
}
 0x25a   : > { %s813_s26 = scalar_lea.hbm %s1039_s21, 32  ;;  %s817_s13 = scalar_lea.hbm %s1082_s8, 64 }
 0x25b   : > { %p814_p4 = scmp.ne.s32.totalorder %s1039_s21, %s813_s26  ;;  %p818_p9 = scmp.lt.s32.totalorder %s1039_s21, %s1082_s8 }
 0x25c   : > { %p819_p10 = scmp.lt.s32.totalorder %s817_s13, %s813_s26 }
 0x25d   : > { %p815_p7 = pnand %p814_p4, %p948_p5 }
 0x25e   : > { %p820_p11 = por %p819_p10, %p818_p9 }
 0x25f   : > { %p816_p8 = pneg %p815_p7 }
 0x261   : > { %p821_p12 = pnand %p820_p11, %p816_p8 }
 0x263   : > { %824 = shalt.err (!%p821_p12)
}
 0x264   : > { %739 = dma.vmem_to_hbm [thread:$0]  (%p948_p5), %s628_s18, 32, %s1039_s21, %s614_s22  }
 0x265 PF: > { %p745_p13 = scmp.ge.s32.totalorder %s859_s30, 2  ;;  %s639_s20 = sand.u32 1, %s847_s27  }
 0x266   : > { %s640_s23 = scalar_lea.sflag [#allocation3], %s639_s20 }
 0x267   : > { %p742_p0 = pnand %p745_p13, %p952_p6 }
 0x269   : > { %p743_p1 = pneg %p742_p0 }
 0x26b   : > { %842 = dma.done.wait (%p743_p1), %s640_s23, 32  }
 0x26c   : > { %844 = vsyncadd (%p743_p1), %s640_s23, 4294967264  ;;  %p18_p2 = scmp.ge.s32.totalorder %s935_s11, 4   ;;  %s1085_s27 = smov %s851_s28 }
 0x26d   : > { %s1086_s28 = smov %s855_s29  ;;  %s1087_s29 = smov %s946_s14 }
 0x26e   : > { %s1088_s30 = smov %s935_s11  ;;  %20 = sbr.rel (!%p18_p2) target bundleno = 3 (0x3), region = 87 }
 0x273   :  { %645 = vsyncpa [#allocation3], 1 }
 0x274   :  { %647 = vsyncpa [#allocation3 + $0x1], 1 }

</bundles_post_ra>
